<compile_context>
chip_gen: v7x
topology: tpu7x:2x2x1
jax: 0.10.0
libtpu: 0.0.40
codegen_flags: <defaults>
</compile_context>

<pallas_src>
import functools

import jax
import jax.numpy as jnp
from jax.experimental import pallas as pl
from jax.experimental.pallas import tpu as pltpu


# ---------------------------------------------------------------------------
# Shared gate math (runs on values already loaded into vregs, all f32 accum).
# ---------------------------------------------------------------------------
def _gru_dh(h, u_rz, u_h, b_rz, b_h, hidden):
    # Fused r/z gate: one MXU call producing a lane-dense [B, 2H] slab.
    rz = jax.nn.sigmoid(
        jnp.dot(h, u_rz, preferred_element_type=jnp.float32) + b_rz)
    r = rz[:, :hidden]
    z = rz[:, hidden:]
    h_tilde = jnp.tanh(
        jnp.dot(h * r, u_h, preferred_element_type=jnp.float32) + b_h)
    return (1.0 - z) * (h_tilde - h)


# ---------------------------------------------------------------------------
# Kernel 1: single-step forward -> joint_dh (matches module.forward exactly).
# ---------------------------------------------------------------------------
def gruode_dh_kernel(h_ref, u_rz_ref, u_h_ref, b_rz_ref, b_h_ref, dh_ref,
                     *, hidden):
    dh = _gru_dh(h_ref[...], u_rz_ref[...], u_h_ref[...],
                 b_rz_ref[...], b_h_ref[...], hidden)
    dh_ref[...] = dh.astype(dh_ref.dtype)


# ---------------------------------------------------------------------------
# Kernel 2: fused explicit-Euler integration over T steps.
#   Grid axis = time, marked "arbitrary" (sequential carry).  Weights/biases
#   use a constant index_map -> resident in VMEM for the whole trajectory.
#   The hidden state is carried in the resident output block (accumulator
#   pattern): initialized at step 0, updated in place, written back once.
# ---------------------------------------------------------------------------
def gruode_euler_kernel(h0_ref, u_rz_ref, u_h_ref, b_rz_ref, b_h_ref, h_ref,
                        *, dt, hidden):
    @pl.when(pl.program_id(0) == 0)
    def _():
        h_ref[...] = h0_ref[...]

    h = h_ref[...]
    dh = _gru_dh(h, u_rz_ref[...], u_h_ref[...],
                 b_rz_ref[...], b_h_ref[...], hidden)
    h_ref[...] = (h + dt * dh).astype(h_ref.dtype)


# ---------------------------------------------------------------------------
# Wrappers (layout plumbing: gate-wise weight/bias packing happens here).
# ---------------------------------------------------------------------------
def _fuse_params(params):
    U_r, U_z, U_h, b_r, b_z, b_h = params
    H = U_r.shape[0]
    U_rz = jnp.concatenate([U_r, U_z], axis=1)                  # [H, 2H]
    b_rz = jnp.concatenate([b_r, b_z]).reshape(1, 2 * H)        # [1, 2H]
    b_h2 = b_h.reshape(1, H)                                    # [1, H]
    return U_rz, U_h, b_rz, b_h2


def joint_gruode_dh(joint_h, params):
    """One call to module.forward: returns joint_dh with shape [B, H]."""
    B, H = joint_h.shape
    U_rz, U_h, b_rz, b_h2 = _fuse_params(params)
    full = lambda shape: pl.BlockSpec(shape, lambda: (0,) * len(shape))
    return pl.pallas_call(
        functools.partial(gruode_dh_kernel, hidden=H),
        out_shape=jax.ShapeDtypeStruct((B, H), joint_h.dtype),
        in_specs=[full((B, H)), full((H, 2 * H)), full((H, H)),
                  full((1, 2 * H)), full((1, H))],
        out_specs=full((B, H)),
    )(joint_h, U_rz, U_h, b_rz, b_h2)


def joint_gruode_euler(joint_h0, params, *, dt, num_steps):
    """h_{t+1} = h_t + dt * forward(t, h_t), fused over num_steps steps."""
    B, H = joint_h0.shape
    U_rz, U_h, b_rz, b_h2 = _fuse_params(params)
    full = lambda shape: pl.BlockSpec(shape, lambda t: (0,) * len(shape))
    return pl.pallas_call(
        functools.partial(gruode_euler_kernel, dt=dt, hidden=H),
        out_shape=jax.ShapeDtypeStruct((B, H), joint_h0.dtype),
        grid=(num_steps,),
        in_specs=[full((B, H)), full((H, 2 * H)), full((H, H)),
                  full((1, 2 * H)), full((1, H))],
        out_specs=full((B, H)),
        compiler_params=pltpu.CompilerParams(
            dimension_semantics=("arbitrary",)),
    )(joint_h0, U_rz, U_h, b_rz, b_h2)


# ---------------------------------------------------------------------------
# Parameter init mimicking the PyTorch module (U_*: orthogonal, b_*: zeros).
# ---------------------------------------------------------------------------
def init_params(key, input_size, joint_hidden_size, n_dim):
    del input_size, n_dim  # stored on the module but unused in forward
    H = joint_hidden_size
    keys = jax.random.split(key, 3)

    def orthogonal(k, n):
        a = jax.random.normal(k, (n, n), jnp.float32)
        q, r = jnp.linalg.qr(a)
        return q * jnp.sign(jnp.diag(r))

    U_r = orthogonal(keys[0], H)
    U_z = orthogonal(keys[1], H)
    U_h = orthogonal(keys[2], H)
    b_r = jnp.zeros((H,), jnp.float32)
    b_z = jnp.zeros((H,), jnp.float32)
    b_h = jnp.zeros((H,), jnp.float32)
    return (U_r, U_z, U_h, b_r, b_z, b_h)


# ---------------------------------------------------------------------------
# Pure-JAX references.
# ---------------------------------------------------------------------------
def joint_gruode_dh_ref(joint_h, params):
    U_r, U_z, U_h, b_r, b_z, b_h = params
    r = jax.nn.sigmoid(joint_h @ U_r + b_r)
    z = jax.nn.sigmoid(joint_h @ U_z + b_z)
    h_tilde = jnp.tanh((joint_h * r) @ U_h + b_h)
    return (1.0 - z) * (h_tilde - joint_h)


def joint_gruode_euler_ref(joint_h0, params, *, dt, num_steps):
    h = joint_h0
    for _ in range(num_steps):
        h = h + dt * joint_gruode_dh_ref(h, params)
    return h


if __name__ == "__main__":
    # Small shapes consistent with the module: hidden H=32, batch B=8.
    input_size, n_dim, H, B = 8, 4, 32, 8
    num_steps, dt = 16, 0.05

    key = jax.random.PRNGKey(0)
    k_params, k_h = jax.random.split(key, 2)
    params = init_params(k_params, input_size, H, n_dim)
    joint_h = jax.random.normal(k_h, (B, H), jnp.float32)

    # Single step of module.forward (returns dh).
    dh = jax.block_until_ready(joint_gruode_dh(joint_h, params))
    dh_ref = joint_gruode_dh_ref(joint_h, params)
    assert dh.shape == (B, H)
    assert jnp.allclose(dh, dh_ref, atol=1e-5, rtol=1e-5), "dh mismatch"

    # Fused Euler trajectory (time loop hoisted into the kernel grid).
    h_T = jax.block_until_ready(
        joint_gruode_euler(joint_h, params, dt=dt, num_steps=num_steps))
    h_T_ref = joint_gruode_euler_ref(joint_h, params, dt=dt,
                                     num_steps=num_steps)
    assert h_T.shape == (B, H)
    assert jnp.allclose(h_T, h_T_ref, atol=1e-4, rtol=1e-4), "euler mismatch"

    print("KERNEL_OK")
</pallas_src>

<mosaic_0001>
module attributes {stable_mosaic.version = 11 : i64} {
  func.func @gruode_dh_kernel(%arg0: memref<8x32xf32, #tpu.memory_space<vmem>>, %arg1: memref<32x64xf32, #tpu.memory_space<vmem>>, %arg2: memref<32x32xf32, #tpu.memory_space<vmem>>, %arg3: memref<1x64xf32, #tpu.memory_space<vmem>>, %arg4: memref<1x32xf32, #tpu.memory_space<vmem>>, %arg5: memref<8x32xf32, #tpu.memory_space<vmem>>) attributes {dimension_semantics = [], scalar_prefetch = 0 : i64, scratch_operands = 0 : i64, tpu.core_type = #tpu.core_type<tc>} {
    %c0 = arith.constant 0 : index
    %c0_0 = arith.constant 0 : index
    %0 = vector.load %arg0[%c0, %c0_0] : memref<8x32xf32, #tpu.memory_space<vmem>>, vector<8x32xf32>
    %c0_1 = arith.constant 0 : index
    %c0_2 = arith.constant 0 : index
    %1 = vector.load %arg1[%c0_1, %c0_2] : memref<32x64xf32, #tpu.memory_space<vmem>>, vector<32x64xf32>
    %c0_3 = arith.constant 0 : index
    %c0_4 = arith.constant 0 : index
    %2 = vector.load %arg2[%c0_3, %c0_4] : memref<32x32xf32, #tpu.memory_space<vmem>>, vector<32x32xf32>
    %c0_5 = arith.constant 0 : index
    %c0_6 = arith.constant 0 : index
    %3 = vector.load %arg3[%c0_5, %c0_6] : memref<1x64xf32, #tpu.memory_space<vmem>>, vector<1x64xf32>
    %c0_7 = arith.constant 0 : index
    %c0_8 = arith.constant 0 : index
    %4 = vector.load %arg4[%c0_7, %c0_8] : memref<1x32xf32, #tpu.memory_space<vmem>>, vector<1x32xf32>
    %cst = arith.constant dense<0.000000e+00> : vector<8x64xf32>
    %5 = tpu.matmul %0, %1, %cst {dimension_numbers = #tpu.dot_dimension_numbers<[1], [0], [0], [1], [0, 0, 1, 1], [], []>} : vector<8x32xf32>, vector<32x64xf32>, vector<8x64xf32> -> vector<8x64xf32>
    %6 = vector.broadcast %3 : vector<1x64xf32> to vector<8x64xf32>
    %7 = arith.addf %5, %6 : vector<8x64xf32>
    %8 = arith.negf %7 : vector<8x64xf32>
    %9 = math.exp %8 : vector<8x64xf32>
    %cst_9 = arith.constant 1.000000e+00 : f32
    %10 = vector.broadcast %cst_9 : f32 to vector<8x64xf32>
    %11 = arith.addf %10, %9 : vector<8x64xf32>
    %12 = arith.divf %10, %11 : vector<8x64xf32>
    %13 = vector.extract_strided_slice %12 {offsets = [0, 0], sizes = [8, 32], strides = [1, 1]} : vector<8x64xf32> to vector<8x32xf32>
    %14 = vector.extract_strided_slice %12 {offsets = [0, 32], sizes = [8, 32], strides = [1, 1]} : vector<8x64xf32> to vector<8x32xf32>
    %15 = arith.mulf %0, %13 : vector<8x32xf32>
    %cst_10 = arith.constant dense<0.000000e+00> : vector<8x32xf32>
    %16 = tpu.matmul %15, %2, %cst_10 {dimension_numbers = #tpu.dot_dimension_numbers<[1], [0], [0], [1], [0, 0, 1, 1], [], []>} : vector<8x32xf32>, vector<32x32xf32>, vector<8x32xf32> -> vector<8x32xf32>
    %17 = vector.broadcast %4 : vector<1x32xf32> to vector<8x32xf32>
    %18 = arith.addf %16, %17 : vector<8x32xf32>
    %19 = math.tanh %18 : vector<8x32xf32>
    %cst_11 = arith.constant 1.000000e+00 : f32
    %20 = vector.broadcast %cst_11 : f32 to vector<8x32xf32>
    %21 = arith.subf %20, %14 : vector<8x32xf32>
    %22 = arith.subf %19, %0 : vector<8x32xf32>
    %23 = arith.mulf %21, %22 : vector<8x32xf32>
    %c0_12 = arith.constant 0 : index
    %c0_13 = arith.constant 0 : index
    %24 = vector.load %arg5[%c0_12, %c0_13] : memref<8x32xf32, #tpu.memory_space<vmem>>, vector<8x32xf32>
    tpu.vector_store %arg5[%c0_12, %c0_13], %23 {strides = array<i32>} : memref<8x32xf32, #tpu.memory_space<vmem>>, vector<8x32xf32>,
    return
  }
}

</mosaic_0001>

<bundles_post_ra>
// kernel: tpu_custom_call.1
= control target key start
LH: loop header
LB: loop body
LE: loop exit
PB: predicated region body
PF: predicated region fallthrough
CT: control target
= control target key end

     0   :  { %10 = vsyncpa [#allocation3], 0  ;;  %s530_s0 = inlined_call_operand.hbm [shape: f32[8,32], index: 0, kind: input, shape index: {}]   ;;  %s531_s1 = inlined_call_operand.hbm [shape: f32[32,64], index: 1, kind: input, shape index: {}]   ;;  %s532_s2 = inlined_call_operand.hbm [shape: f32[32,32], index: 2, kind: input, shape index: {}]   ;;  %s533_s3 = inlined_call_operand.vmem [shape: f32[1,64], index: 3, kind: input, shape index: {}]   ;;  %s534_s4 = inlined_call_operand.vmem [shape: f32[1,32], index: 4, kind: input, shape index: {}]   ;;  %s535_s5 = inlined_call_operand.hbm [shape: f32[8,32], index: 5, kind: output, shape index: {}]  }
   0x1   :  { %11 = vsyncpa [#allocation6], 0 }
   0x2   :  { %12 = vsyncpa [#allocation4], 0  ;;  %s426_s18 = smov [#allocation5]   ;;  %s332_s22 = scalar_lea.hbm %s531_s1, 512 }
   0x3   :  { %s28_s19 = sshll.u32 %s426_s18, 4  ;;  %p333_p0 = scmp.ne.s32.totalorder %s531_s1, %s332_s22  ;;  %s29_s19 = int_to_ptr.vmem [resolvable:$true] %s28_s19 }
   0x4   :  { %p336_p1 = scmp.lt.u32.totalorder %s332_s22, %s531_s1 }
   0x6   :  { %p338_p2 = pnand %p336_p1, %p333_p0 }
   0x8   :  { %341 = shalt.err (!%p338_p2)
}
   0x9   :  { %s342_s27 = scalar_lea.vmem %s29_s19, 512  ;;  %p347_p4 = scmp.lt.s32.totalorder %s29_s19, %s29_s19 }
   0xa   :  { %p343_p3 = scmp.ne.s32.totalorder %s29_s19, %s342_s27  ;;  %p348_p5 = scmp.lt.s32.totalorder %s342_s27, %s342_s27 }
   0xc   :  { %p349_p6 = por %p348_p5, %p347_p4 }
   0xe   :  { %p350_p7 = pnand %p349_p6, %p343_p3 }
  0x10   :  { %353 = shalt.err (!%p350_p7)
}
  0x11   :  { %s427_s28 = smov 128   ;;  %s428_s29 = smov 8  }
  0x12   :  { %34 = dma.hbm_to_vmem [thread:$0]  %s531_s1, 512, %s29_s19, [#allocation6], %s427_s28, %s427_s28, %s428_s29  }
  0x13   :  { %s429_s7 = smov [#allocation2]   ;;  %s430_s9 = smov [#allocation7]  }
  0x14   :  { %s19_s8 = sshll.u32 %s429_s7, 4  ;;  %s40_s10 = sshll.u32 %s430_s9, 4  ;;  %s20_s8 = int_to_ptr.vmem [resolvable:$true] %s19_s8  ;;  %s41_s10 = int_to_ptr.vmem [resolvable:$true] %s40_s10 }
  0x15   :  { %s354_s13 = scalar_lea.hbm %s530_s0, 128 }
  0x16   :  { %p355_p8 = scmp.ne.s32.totalorder %s530_s0, %s354_s13  ;;  %p358_p9 = scmp.lt.u32.totalorder %s354_s13, %s530_s0 }
  0x18   :  { %p360_p10 = pnand %p358_p9, %p355_p8 }
  0x1a   :  { %363 = shalt.err (!%p360_p10)
}
  0x1b   :  { %s364_s1 = scalar_lea.vmem %s20_s8, 128  ;;  %p369_p12 = scmp.lt.s32.totalorder %s20_s8, %s20_s8 }
  0x1c   :  { %p365_p11 = scmp.ne.s32.totalorder %s20_s8, %s364_s1  ;;  %p370_p13 = scmp.lt.s32.totalorder %s364_s1, %s364_s1 }
  0x1e   :  { %p371_p0 = por %p370_p13, %p369_p12 }
  0x20   :  { %p372_p1 = pnand %p371_p0, %p365_p11 }
  0x22   :  { %375 = shalt.err (!%p372_p1)
}
  0x23   :  { %22 = dma.hbm_to_vmem [thread:$0]  %s530_s0, 128, %s20_s8, [#allocation3]  }
  0x24   :  { %s376_s22 = scalar_lea.hbm %s532_s2, 512 }
  0x25   :  { %p377_p2 = scmp.ne.s32.totalorder %s532_s2, %s376_s22  ;;  %p380_p3 = scmp.lt.u32.totalorder %s376_s22, %s532_s2 }
  0x27   :  { %p382_p4 = pnand %p380_p3, %p377_p2 }
  0x29   :  { %385 = shalt.err (!%p382_p4)
}
  0x2a   :  { %s386_s27 = scalar_lea.vmem %s41_s10, 512  ;;  %p391_p6 = scmp.lt.s32.totalorder %s41_s10, %s41_s10 }
  0x2b   :  { %p387_p5 = scmp.ne.s32.totalorder %s41_s10, %s386_s27  ;;  %p392_p7 = scmp.lt.s32.totalorder %s386_s27, %s386_s27 }
  0x2d   :  { %p393_p8 = por %p392_p7, %p391_p6 }
  0x2f   :  { %p394_p9 = pnand %p393_p8, %p387_p5 }
  0x31   :  { %397 = shalt.err (!%p394_p9)
}
  0x32   :  { %46 = dma.hbm_to_vmem [thread:$0]  %s532_s2, 512, %s41_s10, [#allocation6], %s427_s28, %s427_s28, %s428_s29  }
  0x33   :  { %420 = dma.done.wait [#allocation3], 128  }
  0x34   :  { %421 = vsyncadd [#allocation3], 4294967168 }
  0x35   :  { %422 = dma.done.wait [#allocation6], 1024  }
  0x36   :  { %423 = vsyncadd [#allocation6], 4294966272  ;;  %v431_v0 = vmov 0.0|0.0   ;;  %vm432_vm0 = vmmov 0   ;;  %v433_v1 = vmov 0.0   ;;  %v61_v2 = vld [vmem:[#allocation5] sm:$0xff] }
  0x37   :  { %303 = vmatprep.subr.bf16.mxu0 %v431_v0  ;;  %289 = vmatprep.mubr.msk.f32.mxu0 %vm432_vm0, %v433_v1  ;;  %v62_v3 = vld [vmem:[#allocation5 + $0x8] sm:$0xff]  ;;  %v63_v4 = vld [vmem:[#allocation5 + $0x10] sm:$0xff]  ;;  %v64_v6 = vld [vmem:[#allocation5 + $0x18] sm:$0xff]  ;;  %vm77_vm1 = vcmask 261120   ;;  %s435_s7 = smov 96   ;;  %s436_s8 = smov [#allocation8]  }
  0x38   :  { %309 = vmatprep.subr.bf16.mxu1 %v431_v0  ;;  %300 = vmatprep.mubr.msk.f32.mxu1 %vm432_vm0, %v433_v1  ;;  %v304_v5 = vpack.c.bf16 %v62_v3, %v61_v2  ;;  %v307_v7 = vpack.c.bf16 %v64_v6, %v63_v4  ;;  %v60_v8 = vld [vmem:[#allocation2] sm:$0xff]  ;;  %v65_v9 = vld [vmem:[#allocation7] sm:$0xff]  ;;  %v66_v10 = vld [vmem:[#allocation7 + $0x8] sm:$0xff]  ;;  %s256_s9 = sshll.u32 %s436_s8, 4  ;;  %s257_s9 = int_to_ptr.vmem [resolvable:$true] %s256_s9 }
  0x39   :  { %v67_v11 = vld [vmem:[#allocation7 + $0x10] sm:$0xff]  ;;  %v310_v12 = vpack.c.bf16 %v66_v10, %v65_v9  ;;  %v68_v13 = vld [vmem:[#allocation7 + $0x18] sm:$0xff]  ;;  %p403_p11 = scmp.lt.s32.totalorder %s257_s9, %s257_s9 }
  0x3a   :  { %305 = vmatpush3.bf16.msra.mxu0 %v304_v5  ;;  %v313_v14 = vpack.c.bf16 %v68_v13, %v67_v11  ;;  %v266_v15 = vld [vmem:[%s533_s3] ss:$0 sm:$0xff]  ;;  %s434_s3 = smov 32  }
  0x3b   :  { %306 = vmatprep.subr.bf16.mxu0 %v431_v0  ;;  %311 = vmatpush3.bf16.msra.mxu1 %v310_v12  ;;  %v269_v24 = vld [vmem:[%s534_s4] ss:$0 sm:$0xff]  ;;  %s398_s4 = scalar_lea.vmem %s257_s9, 128 }
  0x3c   :  { %312 = vmatprep.subr.bf16.mxu1 %v431_v0  ;;  %p399_p10 = scmp.ne.s32.totalorder %s257_s9, %s398_s4  ;;  %p404_p12 = scmp.lt.s32.totalorder %s398_s4, %s398_s4 }
  0x3e   :  { %308 = vmatpush3.bf16.msra.mxu0 %v307_v7  ;;  %p405_p13 = por %p404_p12, %p403_p11 }
  0x3f   :  { %314 = vmatpush3.bf16.msra.mxu1 %v313_v14 }
  0x40   :  { %p406_p0 = pnand %p405_p13, %p399_p10 }
  0x41   :  { %290 = vmatmul.mubr.msk.f32.vlgmr.msra.gmra.mrb[0].mxu0 %vm77_vm1, %v60_v8 }
 0x114   :  { %v147_v16 = vpop.f32.mrb[0].mxu0 }
 0x115   :  { %v148_v17 = vadd.f32 %v266_v15, %v147_v16  ;;  %v291_v18 = vpop.f32.mrb[1].mxu0 }
 0x117   :  { %v268_v19 = vmul.f32 -1.442695, %v148_v17 }
 0x119   :  { %326 = vpow2.f32 %v268_v19 }
 0x123   :  { %v327_v20 = vpop.eup %326 }
 0x124   :  { %v154_v21 = vadd.f32 1.0, %v327_v20 }
 0x126   :  { %328 = vrcp.f32 %v154_v21 }
 0x130   :  { %v329_v22 = vpop.eup %328 }
 0x131   :  { %v157_v23 = vmul.f32 %v329_v22, %v60_v8  ;;  %v238_v30 = vsub.f32 1.0, %v329_v22 }
 0x133   :  { %301 = vmatmul.mubr.msk.f32.vlgmr.msra.gmra.mrb[0].mxu1 %vm77_vm1, %v157_v23 }
 0x206   :  { %v233_v25 = vpop.f32.mrb[0].mxu1 }
 0x207   :  { %v234_v26 = vadd.f32 %v269_v24, %v233_v25  ;;  %v302_v27 = vpop.f32.mrb[1].mxu1 }
 0x209   :  { %330 = vtanh.f32 %v234_v26 }
 0x213   :  { %v331_v28 = vpop.eup %330 }
 0x214   :  { %v239_v29 = vsub.f32 %v331_v28, %v60_v8 }
 0x216   :  { %241 = vrot.lane.b32.xlu0 %v239_v29, %s434_s3 }
 0x288   :  { %v242_v31 = vpop.permute.xlu0 %241 }
 0x289   :  { %v244_v32 = vmul.f32 %v242_v31, %v238_v30 }
 0x28b   :  { %246 = vrot.lane.b32.xlu0 %v244_v32, %s435_s7 }
 0x2fd   :  { %v247_v33 = vpop.permute.xlu0 %246 }
 0x2fe   :  { %249 = vst.msk [vmem:[#allocation8] sm:$0xff] %vm77_vm1, %v247_v33 }
 0x2ff   :  { %409 = shalt.err (!%p406_p0)
}
 0x300   :  { %s410_s12 = scalar_lea.hbm %s535_s5, 128 }
 0x301   :  { %p411_p1 = scmp.ne.s32.totalorder %s535_s5, %s410_s12  ;;  %p414_p2 = scmp.lt.u32.totalorder %s410_s12, %s535_s5 }
 0x303   :  { %p416_p3 = pnand %p414_p2, %p411_p1 }
 0x305   :  { %419 = shalt.err (!%p416_p3)
}
 0x306   :  { %259 = dma.vmem_to_hbm [thread:$0]  %s257_s9, 128, %s535_s5, [#allocation4]  }
 0x307   :  { %424 = dma.done.wait [#allocation4], 128  }
 0x308   :  { %425 = vsyncadd [#allocation4], 4294967168 }
 0x309   :  { %263 = vsyncpa [#allocation3], 1 }
 0x30a   :  { %264 = vsyncpa [#allocation6], 1 }
 0x30b   :  { %265 = vsyncpa [#allocation4], 1 }

</bundles_post_ra>
